<compile_context>
chip_gen: v5e
topology: v5e:2x2
jax: 0.10.0
libtpu: 0.0.40
codegen_flags: <defaults>
</compile_context>

<pallas_src>
import functools

import jax
import jax.numpy as jnp
from jax.experimental import pallas as pl
from jax.experimental.pallas import tpu as pltpu


def fused_bn_relu_conv_kernel(x_ref, scale_ref, bias_ref, w_ref, o_ref, pad_ref,
                              *, padding, stride):
    # x_ref:     (1, H, W*C)          one image, channels merged into lanes (NHWC)
    # scale_ref: (1, W*C)             BN scale tiled over W
    # bias_ref:  (1, W*C)             BN bias  tiled over W
    # w_ref:     (KH, W*C, Wo*Cout)   banded im2col weights; horizontal zero
    #                                 padding folded in as dropped (zero) rows
    # o_ref:     (1, Ho, Wo*Cout)     lane-dense output tile
    # pad_ref:   VMEM scratch (H + 2*padding, W*C)  -- vertical padding only
    H, WC = x_ref.shape[1], x_ref.shape[2]
    KH = w_ref.shape[0]
    Ho, WoCout = o_ref.shape[1], o_ref.shape[2]
    Hp = pad_ref.shape[0]

    # Zero only the vertical padding border, and only once: the scratch persists
    # across grid iterations and the interior rows are overwritten every step.
    if padding > 0:
        @pl.when(pl.program_id(0) == 0)
        def _():
            zeros = jnp.zeros((padding, WC), pad_ref.dtype)
            pad_ref[0:padding, :] = zeros
            pad_ref[Hp - padding:Hp, :] = zeros

    # BN (eval-mode affine) + ReLU, stored at lane offset 0 (dense lane store;
    # the remaining `padding`-row sublane offset is cheap).
    y = jnp.maximum(x_ref[0] * scale_ref[...] + bias_ref[...], 0.0)
    pad_ref[padding:padding + H, :] = y

    # Convolution: KH MXU contractions of depth K = W*C into a (Ho, Wo*Cout)
    # register accumulator (2 vregs at this size).
    # TODO(synk): at real DSOD sizes (C in the hundreds, larger H/W) replace the
    # banded matrix with per-tap K=C matmuls (pltpu.roll lane shifts against
    # small (C, Cout) weight tiles) and row-tile Ho with a (KH-1)-row halo on a
    # "parallel" grid axis; the banded B wastes ~KW/W of the MXU FLOPs and its
    # O(W*C*Wo*Cout) VMEM footprint does not scale (v7x has 64 MiB VMEM).
    acc = jnp.zeros((Ho, WoCout), jnp.float32)
    for kh in range(KH):
        if stride == 1:
            a = pad_ref[kh:kh + Ho, :]
        else:
            # TODO(synk): stride>1 path (strided row slice) is untested here.
            a = pad_ref[pl.ds(kh, Ho, stride), :]
        # TODO(synk): cast `a` / `w_ref[kh]` to bf16 on v6e/v7x for native MXU
        # throughput; kept f32 here to stay within the 1e-4 reference check.
        acc = acc + jnp.dot(a, w_ref[kh], preferred_element_type=jnp.float32)

    o_ref[...] = acc[None].astype(o_ref.dtype)


def single_layer_forward_nhwc(x_nhwc, gamma, beta, running_mean, running_var,
                              weight, *, stride, padding, eps=1e-5):
    """Core path: NHWC in, NHWC out (no layout transposes around the kernel)."""
    N, H, W, C = x_nhwc.shape
    Cout, Cin, KH, KW = weight.shape
    assert Cin == C

    Hp, Wp = H + 2 * padding, W + 2 * padding
    Ho = (Hp - KH) // stride + 1
    Wo = (Wp - KW) // stride + 1
    WC, WoCout = W * C, Wo * Cout

    x = x_nhwc.astype(jnp.float32).reshape(N, H, WC)

    # Fold eval-mode BN into a per-channel affine, tiled over W so it broadcasts
    # against the (H, W*C) tile.
    # TODO(synk): training-mode BatchNorm (batch statistics + running-stat
    # update) is not reproduced; eval-mode semantics are used instead.
    scale = (gamma / jnp.sqrt(running_var + eps)).astype(jnp.float32)
    bias = (beta - running_mean * scale).astype(jnp.float32)
    scale_t = jnp.tile(scale, W).reshape(1, WC)
    bias_t = jnp.tile(bias, W).reshape(1, WC)

    # Banded im2col weight over *unpadded* input columns (horizontal padding is
    # folded in by dropping out-of-range taps as zero rows):
    #   B[kh, w'*C + ci, w*Cout + co] = weight[co, ci, kh, kw]
    #       if w' == w*stride + kw - padding and 0 <= w' < W, else 0.
    w_hwio = jnp.transpose(weight, (2, 3, 1, 0)).astype(jnp.float32)  # (KH,KW,C,Cout)
    win = jnp.arange(W)
    wout = jnp.arange(Wo)
    kws = jnp.arange(KW)
    sel = (win[None, :, None]
           == (wout[None, None, :] * stride + kws[:, None, None] - padding)
           ).astype(jnp.float32)                                      # (KW, W, Wo)
    Bmat = jnp.einsum('akco,kpw->apcwo', w_hwio, sel).reshape(KH, WC, WoCout)

    out = pl.pallas_call(
        functools.partial(fused_bn_relu_conv_kernel, padding=padding, stride=stride),
        out_shape=jax.ShapeDtypeStruct((N, Ho, WoCout), jnp.float32),
        grid=(N,),
        in_specs=[
            pl.BlockSpec((1, H, WC), lambda n: (n, 0, 0)),
            pl.BlockSpec((1, WC), lambda n: (0, 0)),
            pl.BlockSpec((1, WC), lambda n: (0, 0)),
            # TODO(synk): at real sizes single-buffer the grid-invariant inputs
            # (pipeline_mode=pl.Buffered(1)) to halve their VMEM footprint.
            pl.BlockSpec((KH, WC, WoCout), lambda n: (0, 0, 0)),
        ],
        out_specs=pl.BlockSpec((1, Ho, WoCout), lambda n: (n, 0, 0)),
        scratch_shapes=[pltpu.VMEM((Hp, WC), jnp.float32)],
        compiler_params=pltpu.CompilerParams(
            dimension_semantics=("parallel",),   # batch -> both TCs on v7x
            vmem_limit_bytes=32 * 1024 * 1024,
        ),
    )(x, scale_t, bias_t, Bmat)

    return out.reshape(N, Ho, Wo, Cout)


def single_layer_forward(x_nchw, gamma, beta, running_mean, running_var, weight,
                         *, stride, padding, eps=1e-5):
    """NCHW wrapper matching the PyTorch module interface.

    NOTE: the two transposes below exist only to honor the NCHW spec of the
    reference module; in a real pipeline keep activations NHWC end-to-end and
    call single_layer_forward_nhwc directly (saves two full-tensor HBM passes).
    """
    x_nhwc = jnp.transpose(x_nchw, (0, 2, 3, 1))
    out_nhwc = single_layer_forward_nhwc(
        x_nhwc, gamma, beta, running_mean, running_var, weight,
        stride=stride, padding=padding, eps=eps)
    return jnp.transpose(out_nhwc, (0, 3, 1, 2))


def reference_forward(x_nchw, gamma, beta, running_mean, running_var, weight,
                      *, stride, padding, eps=1e-5):
    C = x_nchw.shape[1]
    scale = (gamma / jnp.sqrt(running_var + eps))
    bias = (beta - running_mean * scale)
    y = jnp.maximum(x_nchw * scale.reshape(1, C, 1, 1) + bias.reshape(1, C, 1, 1), 0.0)
    return jax.lax.conv_general_dilated(
        y, weight, window_strides=(stride, stride),
        padding=[(padding, padding), (padding, padding)],
        dimension_numbers=("NCHW", "OIHW", "NCHW"),
        precision=jax.lax.Precision.HIGHEST)


if __name__ == "__main__":
    # SingleLayer(nChannels=4, nOutChannels=8, kernel_size=3, stride=1, padding=1)
    nChannels, nOutChannels = 4, 8
    kernel_size, stride, padding = 3, 1, 1
    N, H, W = 2, 16, 16

    key = jax.random.PRNGKey(0)
    kx, kw, kg, kb, km, kv = jax.random.split(key, 6)

    x = jax.random.normal(kx, (N, nChannels, H, W), dtype=jnp.float32)

    # Conv2d default init: kaiming_uniform_(a=sqrt(5)) -> U(-1/sqrt(fan_in), 1/sqrt(fan_in))
    fan_in = nChannels * kernel_size * kernel_size
    bound = 1.0 / (fan_in ** 0.5)
    weight = jax.random.uniform(kw, (nOutChannels, nChannels, kernel_size, kernel_size),
                                minval=-bound, maxval=bound, dtype=jnp.float32)

    # Deterministic (non-trivial) BatchNorm parameters / running stats.
    gamma = 0.5 + jax.random.uniform(kg, (nChannels,), dtype=jnp.float32)
    beta = 0.1 * jax.random.normal(kb, (nChannels,), dtype=jnp.float32)
    running_mean = 0.1 * jax.random.normal(km, (nChannels,), dtype=jnp.float32)
    running_var = 0.5 + jax.random.uniform(kv, (nChannels,), dtype=jnp.float32)

    out = single_layer_forward(x, gamma, beta, running_mean, running_var, weight,
                               stride=stride, padding=padding)
    out = jax.block_until_ready(out)

    ref = reference_forward(x, gamma, beta, running_mean, running_var, weight,
                            stride=stride, padding=padding)
    assert out.shape == ref.shape == (N, nOutChannels, H, W)
    assert jnp.allclose(out, ref, atol=1e-4, rtol=1e-4), \
        f"max abs err {jnp.max(jnp.abs(out - ref))}"

    print("KERNEL_OK")
</pallas_src>

<mosaic_0001>
module attributes {stable_mosaic.version = 11 : i64} {
  func.func @fused_bn_relu_conv_kernel(%arg0: i32, %arg1: memref<1x16x64xf32, #tpu.memory_space<vmem>>, %arg2: memref<1x64xf32, #tpu.memory_space<vmem>>, %arg3: memref<1x64xf32, #tpu.memory_space<vmem>>, %arg4: memref<3x64x128xf32, #tpu.memory_space<vmem>>, %arg5: memref<1x16x128xf32, #tpu.memory_space<vmem>>, %arg6: memref<18x64xf32, #tpu.memory_space<vmem>>) attributes {dimension_semantics = [#tpu.dimension_semantics<parallel>], iteration_bounds = array<i64: 2>, scalar_prefetch = 0 : i64, scratch_operands = 1 : i64, tpu.core_type = #tpu.core_type<tc>, window_params = [{transform_indices = @transform_0, window_bounds = array<i64: 1, 16, 64>}, {pipeline_mode = #tpu.pipeline_mode<synchronous>, transform_indices = @transform_1, window_bounds = array<i64: 1, 64>}, {pipeline_mode = #tpu.pipeline_mode<synchronous>, transform_indices = @transform_2, window_bounds = array<i64: 1, 64>}, {pipeline_mode = #tpu.pipeline_mode<synchronous>, transform_indices = @transform_3, window_bounds = array<i64: 3, 64, 128>}, {transform_indices = @transform_4, window_bounds = array<i64: 1, 16, 128>}]} {
    %c0_i32 = arith.constant 0 : i32
    %0 = arith.cmpi eq, %arg0, %c0_i32 : i32
    %1 = arith.extui %0 : i1 to i32
    %c0_i32_0 = arith.constant 0 : i32
    %2 = arith.cmpi ne, %1, %c0_i32_0 : i32
    scf.if %2 {
      %cst_29 = arith.constant 0.000000e+00 : f32
      %32 = vector.broadcast %cst_29 : f32 to vector<1x64xf32>
      %c0_30 = arith.constant 0 : index
      %c0_31 = arith.constant 0 : index
      %33 = vector.load %arg6[%c0_30, %c0_31] : memref<18x64xf32, #tpu.memory_space<vmem>>, vector<1x64xf32>
      tpu.vector_store %arg6[%c0_30, %c0_31], %32 {strides = array<i32>} : memref<18x64xf32, #tpu.memory_space<vmem>>, vector<1x64xf32>,
      %c17 = arith.constant 17 : index
      %c0_32 = arith.constant 0 : index
      %34 = vector.load %arg6[%c17, %c0_32] : memref<18x64xf32, #tpu.memory_space<vmem>>, vector<1x64xf32>
      tpu.vector_store %arg6[%c17, %c0_32], %32 {strides = array<i32>} : memref<18x64xf32, #tpu.memory_space<vmem>>, vector<1x64xf32>,
    } else {
    }
    %c0 = arith.constant 0 : index
    %c0_1 = arith.constant 0 : index
    %c0_2 = arith.constant 0 : index
    %3 = vector.load %arg1[%c0, %c0_1, %c0_2] : memref<1x16x64xf32, #tpu.memory_space<vmem>>, vector<1x16x64xf32>
    %4 = vector.shape_cast %3 : vector<1x16x64xf32> to vector<16x64xf32>
    %c0_3 = arith.constant 0 : index
    %c0_4 = arith.constant 0 : index
    %5 = vector.load %arg2[%c0_3, %c0_4] : memref<1x64xf32, #tpu.memory_space<vmem>>, vector<1x64xf32>
    %6 = vector.broadcast %5 : vector<1x64xf32> to vector<16x64xf32>
    %7 = arith.mulf %4, %6 : vector<16x64xf32>
    %c0_5 = arith.constant 0 : index
    %c0_6 = arith.constant 0 : index
    %8 = vector.load %arg3[%c0_5, %c0_6] : memref<1x64xf32, #tpu.memory_space<vmem>>, vector<1x64xf32>
    %9 = vector.broadcast %8 : vector<1x64xf32> to vector<16x64xf32>
    %10 = arith.addf %7, %9 : vector<16x64xf32>
    %cst = arith.constant 0.000000e+00 : f32
    %11 = vector.broadcast %cst : f32 to vector<16x64xf32>
    %12 = arith.maximumf %10, %11 : vector<16x64xf32>
    %c1 = arith.constant 1 : index
    %c0_7 = arith.constant 0 : index
    %13 = vector.load %arg6[%c1, %c0_7] : memref<18x64xf32, #tpu.memory_space<vmem>>, vector<16x64xf32>
    tpu.vector_store %arg6[%c1, %c0_7], %12 {strides = array<i32>} : memref<18x64xf32, #tpu.memory_space<vmem>>, vector<16x64xf32>,
    %cst_8 = arith.constant 0.000000e+00 : f32
    %14 = vector.broadcast %cst_8 : f32 to vector<16x128xf32>
    %c0_9 = arith.constant 0 : index
    %c0_10 = arith.constant 0 : index
    %15 = vector.load %arg6[%c0_9, %c0_10] : memref<18x64xf32, #tpu.memory_space<vmem>>, vector<16x64xf32>
    %c0_11 = arith.constant 0 : index
    %c0_12 = arith.constant 0 : index
    %c0_13 = arith.constant 0 : index
    %16 = vector.load %arg4[%c0_11, %c0_12, %c0_13] : memref<3x64x128xf32, #tpu.memory_space<vmem>>, vector<1x64x128xf32>
    %17 = vector.shape_cast %16 : vector<1x64x128xf32> to vector<64x128xf32>
    %cst_14 = arith.constant dense<0.000000e+00> : vector<16x128xf32>
    %18 = tpu.matmul %15, %17, %cst_14 {dimension_numbers = #tpu.dot_dimension_numbers<[1], [0], [0], [1], [0, 0, 1, 1], [], []>} : vector<16x64xf32>, vector<64x128xf32>, vector<16x128xf32> -> vector<16x128xf32>
    %19 = arith.addf %14, %18 : vector<16x128xf32>
    %c1_15 = arith.constant 1 : index
    %c0_16 = arith.constant 0 : index
    %20 = vector.load %arg6[%c1_15, %c0_16] : memref<18x64xf32, #tpu.memory_space<vmem>>, vector<16x64xf32>
    %c1_17 = arith.constant 1 : index
    %c0_18 = arith.constant 0 : index
    %c0_19 = arith.constant 0 : index
    %21 = vector.load %arg4[%c1_17, %c0_18, %c0_19] : memref<3x64x128xf32, #tpu.memory_space<vmem>>, vector<1x64x128xf32>
    %22 = vector.shape_cast %21 : vector<1x64x128xf32> to vector<64x128xf32>
    %cst_20 = arith.constant dense<0.000000e+00> : vector<16x128xf32>
    %23 = tpu.matmul %20, %22, %cst_20 {dimension_numbers = #tpu.dot_dimension_numbers<[1], [0], [0], [1], [0, 0, 1, 1], [], []>} : vector<16x64xf32>, vector<64x128xf32>, vector<16x128xf32> -> vector<16x128xf32>
    %24 = arith.addf %19, %23 : vector<16x128xf32>
    %c2 = arith.constant 2 : index
    %c0_21 = arith.constant 0 : index
    %25 = vector.load %arg6[%c2, %c0_21] : memref<18x64xf32, #tpu.memory_space<vmem>>, vector<16x64xf32>
    %c2_22 = arith.constant 2 : index
    %c0_23 = arith.constant 0 : index
    %c0_24 = arith.constant 0 : index
    %26 = vector.load %arg4[%c2_22, %c0_23, %c0_24] : memref<3x64x128xf32, #tpu.memory_space<vmem>>, vector<1x64x128xf32>
    %27 = vector.shape_cast %26 : vector<1x64x128xf32> to vector<64x128xf32>
    %cst_25 = arith.constant dense<0.000000e+00> : vector<16x128xf32>
    %28 = tpu.matmul %25, %27, %cst_25 {dimension_numbers = #tpu.dot_dimension_numbers<[1], [0], [0], [1], [0, 0, 1, 1], [], []>} : vector<16x64xf32>, vector<64x128xf32>, vector<16x128xf32> -> vector<16x128xf32>
    %29 = arith.addf %24, %28 : vector<16x128xf32>
    %30 = vector.shape_cast %29 : vector<16x128xf32> to vector<1x16x128xf32>
    %c0_26 = arith.constant 0 : index
    %c0_27 = arith.constant 0 : index
    %c0_28 = arith.constant 0 : index
    %31 = vector.load %arg5[%c0_26, %c0_27, %c0_28] : memref<1x16x128xf32, #tpu.memory_space<vmem>>, vector<1x16x128xf32>
    tpu.vector_store %arg5[%c0_26, %c0_27, %c0_28], %30 {strides = array<i32>} : memref<1x16x128xf32, #tpu.memory_space<vmem>>, vector<1x16x128xf32>,
    return
  }
  func.func @transform_0(%arg0: i32) -> (i32, i32, i32) {
    %c0_i32 = arith.constant 0 : i32
    %c0_i32_0 = arith.constant 0 : i32
    %c0_i32_1 = arith.constant 0 : i32
    return %arg0, %c0_i32, %c0_i32_0 : i32, i32, i32
  }
  func.func @transform_1(%arg0: i32) -> (i32, i32) {
    %c0_i32 = arith.constant 0 : i32
    %c0_i32_0 = arith.constant 0 : i32
    %c0_i32_1 = arith.constant 0 : i32
    return %c0_i32, %c0_i32_0 : i32, i32
  }
  func.func @transform_2(%arg0: i32) -> (i32, i32) {
    %c0_i32 = arith.constant 0 : i32
    %c0_i32_0 = arith.constant 0 : i32
    %c0_i32_1 = arith.constant 0 : i32
    return %c0_i32, %c0_i32_0 : i32, i32
  }
  func.func @transform_3(%arg0: i32) -> (i32, i32, i32) {
    %c0_i32 = arith.constant 0 : i32
    %c0_i32_0 = arith.constant 0 : i32
    %c0_i32_1 = arith.constant 0 : i32
    %c0_i32_2 = arith.constant 0 : i32
    return %c0_i32, %c0_i32_0, %c0_i32_1 : i32, i32, i32
  }
  func.func @transform_4(%arg0: i32) -> (i32, i32, i32) {
    %c0_i32 = arith.constant 0 : i32
    %c0_i32_0 = arith.constant 0 : i32
    %c0_i32_1 = arith.constant 0 : i32
    return %arg0, %c0_i32, %c0_i32_0 : i32, i32, i32
  }
}

</mosaic_0001>

<bundles_post_ra>
// kernel: tpu_custom_call.1
= control target key start
LH: loop header
LB: loop body
LE: loop exit
PB: predicated region body
PF: predicated region fallthrough
CT: control target
= control target key end

     0   :  { %s977_s0 = inlined_call_operand.hbm [shape: f32[2,16,64], index: 0, kind: input, shape index: {}]   ;;  %s978_s1 = inlined_call_operand.hbm [shape: f32[1,64], index: 1, kind: input, shape index: {}]   ;;  %s979_s2 = inlined_call_operand.vmem [shape: f32[1,64], index: 2, kind: input, shape index: {}]   ;;  %s980_s3 = inlined_call_operand.hbm [shape: f32[3,64,128], index: 3, kind: input, shape index: {}]   ;;  %s981_s4 = inlined_call_operand.hbm [shape: f32[2,16,128], index: 4, kind: output, shape index: {}]  }
   0x1   :  { %982 = sst [smem:[#allocation14_spill]] %s978_s1 }
   0x2   :  { %983 = sst [smem:[#allocation15_spill]] %s980_s3 }
   0x3   :  { %9 = vsyncpa [#allocation4], 0 }
   0x4   :  { %11 = vsyncpa [#allocation4 + $0x1], 0 }
   0x5   :  { %12 = vsyncpa [#allocation7], 0 }
   0x6   :  { %13 = vsyncpa [#allocation5], 0 }
   0x7   :  { %15 = vsyncpa [#allocation5 + $0x1], 0  ;;  %s809_s15 = smov 0   ;;  %s811_s16 = smov 0  }
   0x8   :  { %s813_s17 = smov 0   ;;  %s815_s18 = smov 0  }
   0x9 LB: > { %s830_s19 = sadd.s32 4294967295, %s775_s18   ;;  %s506_s20 = sadd.s32 4294967294, %s775_s18   ;;  %s775_s18 = sphi %s815_s18, %s999_s18   ;;  %s771_s17 = sphi %s813_s17, %s998_s17   ;;  %s767_s16 = sphi %s811_s16, %s997_s16   ;;  %s763_s15 = sphi %s809_s15, %s996_s15  }
   0xa   : > { %s834_s21 = sadd.s32 1, %s775_s18   ;;  %s28_s22 = sadd.s32 1, %s771_s17 }
   0xb   : > { %s25_s23 = ssub.s32 %s775_s18, %s834_s21  ;;  %p35_p0 = scmp.ne.s32.totalorder %s771_s17, %s767_s16 }
   0xc   : > { %p26_p1 = scmp.eq.s32.totalorder %s25_s23, 0  ;;  %p36_p2 = scmp.eq.s32.totalorder %s775_s18, 0 }
   0xd   : > { %p41_p3 = scmp.ne.s32.totalorder %s767_s16, %s763_s15  ;;  %p42_p4 = scmp.eq.s32.totalorder %s830_s19, 0 }
   0xe   : > { %s846_s24 = scalar_select %p26_p1, %s771_s17, %s28_s22  }
   0xf   : > { %p848_p5 = por %p36_p2, %p35_p0  ;;  %p854_p6 = por %p42_p4, %p41_p3 }
  0x10   : > { %984 = sst [smem:[#allocation13_spill]] %s846_s24  ;;  %p128_p7 = scmp.eq.s32.totalorder %s830_s19, 1 }
  0x11   : > { %p134_p8 = scmp.eq.s32.totalorder %s506_s20, 1  ;;  %p507_p9 = scmp.ge.s32.totalorder %s775_s18, 1 }
  0x12   : > { %p141_p10 = scmp.lt.s32.totalorder %s775_s18, 3  ;;  %p861_p11 = por %p128_p7, %p35_p0 }
  0x13   : > { %p865_p12 = por %p134_p8, %p41_p3  ;;  %s990_s1 = sld [smem:[#allocation14_spill]] }
  0x14   : > { %p869_p13 = pnand %p507_p9, %p141_p10  ;;  %s777_s7 = smov [#allocation6]  }
  0x15   : > { %s155_s8 = sshll.u32 %s777_s7, 4  ;;  %p570_p7 = scmp.lt.s32.totalorder %s775_s18, 2  ;;  %s156_s8 = int_to_ptr.vmem [resolvable:$true] %s155_s8 }
  0x16   : > { %p553_p0 = pneg %p869_p13  ;;  %s991_s3 = sld [smem:[#allocation15_spill]] }
  0x17   : > { %p888_p8 = pnand %p570_p7, %p848_p5  ;;  %s778_s13 = smov [#allocation8]  }
  0x18   : > { %p554_p3 = pnand %p553_p0, %p42_p4  ;;  %s169_s14 = sshll.u32 %s778_s13, 4  ;;  %s170_s14 = int_to_ptr.vmem [resolvable:$true] %s169_s14 }
  0x19   : > { %s153_s6 = sshll.u32 %s990_s1, 4  ;;  %s183_s20 = sand.u32 1, %s771_s17   ;;  %s154_s6 = int_to_ptr.hbm [resolvable:$true] %s153_s6 }
  0x1a   : > { %556 = dma.hbm_to_vmem [thread:$0]  (!%p554_p3), %s154_s6, 16, %s156_s8, [#allocation7]  }
  0x1b   : > { %s779_s22 = smov 128   ;;  %s780_s23 = smov 8  }
  0x1c   : > { %s167_s11 = sshll.u32 %s991_s3, 4  ;;  %s511_s30 = sshll.u32 %s183_s20, 4  ;;  %s168_s11 = int_to_ptr.hbm [resolvable:$true] %s167_s11 }
  0x1d   : > { %559 = dma.hbm_to_vmem [thread:$0]  (!%p554_p3), %s168_s11, 3072, %s170_s14, [#allocation7], %s779_s22, %s779_s22, %s780_s23  }
  0x1e   : > { %s531_s5 = sshll.u32 %s775_s18, 4  ;;  %s187_s6 = scalar_lea.vmem [#allocation3], %s511_s30 }
  0x1f   : > { %s192_s10 = scalar_lea.hbm %s977_s0, %s531_s5  ;;  %s195_s25 = sshll.u32 %s187_s6, 4  ;;  %s196_s25 = int_to_ptr.vmem [resolvable:$true] %s195_s25 }
  0x20   : > { %s193_s8 = sshll.u32 %s192_s10, 4  ;;  %s184_s1 = scalar_lea.sflag [#allocation4], %s183_s20  ;;  %s194_s8 = int_to_ptr.hbm [resolvable:$true] %s193_s8 }
  0x21   : > { %s675_s3 = sshra.s32 %s194_s8, 4  ;;  %p679_p9 = pneg %p888_p8  ;;  %s676_s3 = int_to_ptr.hbm [resolvable:$true] %s675_s3 }
  0x22   : > { %s677_s13 = scalar_lea.hbm %s676_s3, 16  ;;  %s682_s24 = scalar_lea.hbm %s977_s0, 32 }
  0x23   : > { %p678_p5 = scmp.ne.s32.totalorder %s676_s3, %s677_s13  ;;  %p683_p3 = scmp.lt.s32.totalorder %s676_s3, %s977_s0 }
  0x24   : > { %p684_p7 = scmp.lt.s32.totalorder %s682_s24, %s677_s13 }
  0x25   : > { %p680_p10 = pnand %p679_p9, %p678_p5 }
  0x26   : > { %p685_p2 = por %p684_p7, %p683_p3 }
  0x27   : > { %p681_p0 = pneg %p680_p10 }
  0x29   : > { %p686_p1 = pnand %p685_p2, %p681_p0 }
  0x2b   : > { %689 = shalt.err (!%p686_p1)
}
  0x2c   : > { %563 = dma.hbm_to_vmem [thread:$0]  (!%p888_p8), %s194_s8, 256, %s196_s25, %s184_s1, %s779_s22, %s779_s22, %s780_s23  }
  0x2d   : > { %207 = sbr.rel (%p869_p13) target bundleno = 233 (0xe9), region = 36  ;;  %s910_s20 = sand.u32 (!%p869_p13), 1, %s767_s16  }
  0x2e   : > { %s515_s30 = sshll.u32 (!%p869_p13), %s910_s20, 4  ;;  %s210_s9 = scalar_lea.sflag (!%p869_p13), [#allocation4], %s910_s20 }
  0x2f   : > { %s914_s10 = scalar_lea.vmem (!%p869_p13), [#allocation3], %s515_s30 }
  0x32   : > { %750 = dma.done.wait (%p854_p6), %s210_s9, 256  }
  0x33   : > { %752 = vsyncadd (%p854_p6), %s210_s9, 4294967040 }
  0x34   : > { %754 = dma.done.wait (%p42_p4), [#allocation7], 3088  }
  0x35   : > { %756 = vsyncadd (%p42_p4), [#allocation7], 4294964208  ;;  %s924_s1 = scalar_lea.vmem [#allocation9], %s515_s30  ;;  %p993_p13 = scmp.ne.s32.totalorder %s830_s19, 0 }
  0x37   : > { %252 = sbr.rel (%p993_p13) target bundleno = 63 (0x3f), region = 52 }
  0x3c   : > { %vm253_vm0 = vcmask 516096   ;;  %v781_v0 = vmov 0.0  }
  0x3d   : > { %254 = vst.msk [vmem:[#allocation2] sm:$0x1] %vm253_vm0, %v781_v0 }
  0x3e   : > { %255 = vst.msk [vmem:[#allocation2 + $0x11] sm:$0x1] %vm253_vm0, %v781_v0 }
  0x3f PF: > { %v364_v1 = vld [vmem:[#allocation8 + $0xb8] sm:$0xff]  ;;  %v363_v2 = vld [vmem:[#allocation8 + $0xb0] sm:$0xff]  ;;  %v362_v6 = vld [vmem:[#allocation8 + $0xa8] sm:$0xff]  ;;  %vm272_vm1 = vcmask 523264   ;;  %s532_s26 = sshll.u32 %s830_s19, 4  ;;  %s411_s23 = sshll.u32 %s924_s1, 4  ;;  %s412_s23 = int_to_ptr.vmem [resolvable:$true] %s411_s23 }
  0x40   : > { %v295_v3 = vld [vmem:[#allocation8 + $0x78] sm:$0xff]  ;;  %379 = vmatpush.msra.mxu2 %v364_v1  ;;  %v294_v5 = vld [vmem:[#allocation8 + $0x70] sm:$0xff]  ;;  %v293_v8 = vld [vmem:[#allocation8 + $0x68] sm:$0xff]  ;;  %s410_s22 = scalar_lea.hbm %s981_s4, %s532_s26  ;;  %s399_s25 = scalar_lea.sflag [#allocation5], %s910_s20 }
  0x41   : > { %310 = vmatpush.msra.mxu0 %v295_v3  ;;  %v284_v4 = vld [vmem:[#allocation8 + $0x38] sm:$0xff]  ;;  %533 = vmatpush.msra.mxu3 %v295_v3  ;;  %v283_v7 = vld [vmem:[#allocation8 + $0x30] sm:$0xff]  ;;  %v282_v9 = vld [vmem:[#allocation8 + $0x28] sm:$0xff]  ;;  %s413_s6 = sshll.u32 %s410_s22, 4  ;;  %s725_s14 = scalar_lea.hbm %s981_s4, 32  ;;  %s414_s6 = int_to_ptr.hbm [resolvable:$true] %s413_s6 }
  0x42   : > { %339 = vmatpush.msra.mxu1 %v284_v4  ;;  %380 = vmatpush.msra.mxu2 %v363_v2  ;;  %v361_v10 = vld [vmem:[#allocation8 + $0xa0] sm:$0xff]  ;;  %v360_v12 = vld [vmem:[#allocation8 + $0x98] sm:$0xff]  ;;  %v359_v14 = vld [vmem:[#allocation8 + $0x90] sm:$0xff]  ;;  %s719_s19 = sshra.s32 %s414_s6, 4  ;;  %s720_s19 = int_to_ptr.hbm [resolvable:$true] %s719_s19 }
  0x43   : > { %311 = vmatpush.msra.mxu0 %v294_v5  ;;  %534 = vmatpush.msra.mxu3 %v294_v5  ;;  %v292_v11 = vld [vmem:[#allocation8 + $0x60] sm:$0xff]  ;;  %v291_v15 = vld [vmem:[#allocation8 + $0x58] sm:$0xff]  ;;  %v290_v20 = vld [vmem:[#allocation8 + $0x50] sm:$0xff]  ;;  %s721_s8 = scalar_lea.hbm %s720_s19, 16  ;;  %p726_p2 = scmp.lt.s32.totalorder %s720_s19, %s981_s4 }
  0x44   : > { %340 = vmatpush.msra.mxu1 %v283_v7  ;;  %381 = vmatpush.msra.mxu2 %v362_v6  ;;  %v281_v13 = vld [vmem:[#allocation8 + $0x20] sm:$0xff]  ;;  %v280_v16 = vld [vmem:[#allocation8 + $0x18] sm:$0xff]  ;;  %v279_v22 = vld [vmem:[#allocation8 + $0x10] sm:$0xff]  ;;  %p722_p4 = scmp.ne.s32.totalorder %s720_s19, %s721_s8  ;;  %p727_p8 = scmp.lt.s32.totalorder %s725_s14, %s721_s8 }
  0x45   : > { %312 = vmatpush.msra.mxu0 %v293_v8  ;;  %535 = vmatpush.msra.mxu3 %v293_v8  ;;  %v256_v17 = vld [vmem:[%s914_s10] sm:$0xff]  ;;  %v257_v18 = vld [vmem:[%s914_s10 + $0x8] sm:$0xff] }
  0x46   : > { %341 = vmatpush.msra.mxu1 %v282_v9  ;;  %382 = vmatpush.msra.mxu2 %v361_v10  ;;  %v613_v19 = vld [vmem:[#allocation6] ss:$0 sm:$0xff]  ;;  %v614_v21 = vld [vmem:[%s979_s2] ss:$0 sm:$0xff]  ;;  %v358_v25 = vld [vmem:[#allocation8 + $0x88] sm:$0xff]  ;;  %p723_p6 = pnand %p722_p4, %p861_p11  ;;  %p728_p5 = por %p727_p8, %p726_p2 }
  0x47   : > { %313 = vmatpush.msra.mxu0 %v292_v11  ;;  %536 = vmatpush.msra.mxu3 %v292_v11  ;;  %v262_v23 = vmul.f32 %v613_v19, %v256_v17  ;;  %v263_v24 = vmul.f32 %v613_v19, %v257_v18  ;;  %v289_v26 = vld [vmem:[#allocation8 + $0x48] sm:$0xff]  ;;  %v357_v30 = vld [vmem:[#allocation8 + $0x80] sm:$0xff] }
  0x48   : > { %342 = vmatpush.msra.mxu1 %v281_v13  ;;  %383 = vmatpush.msra.mxu2 %v360_v12  ;;  %v278_v29 = vld [vmem:[#allocation8 + $0x8] sm:$0xff]  ;;  %v288_v31 = vld [vmem:[#allocation8 + $0x40] sm:$0xff]  ;;  %p724_p1 = pneg %p723_p6 }
  0x49   : > { %314 = vmatpush.msra.mxu0 %v291_v15  ;;  %537 = vmatpush.msra.mxu3 %v291_v15  ;;  %v268_v27 = vadd.f32 %v614_v21, %v262_v23  ;;  %v269_v28 = vadd.f32 %v614_v21, %v263_v24  ;;  %v277_v34 = vld [vmem:[#allocation8] sm:$0xff] }
  0x4a   : > { %343 = vmatpush.msra.mxu1 %v280_v16  ;;  %384 = vmatpush.msra.mxu2 %v359_v14  ;;  %p729_p9 = pnand %p728_p5, %p724_p1 }
  0x4b   : > { %315 = vmatpush.msra.mxu0 %v290_v20  ;;  %538 = vmatpush.msra.mxu3 %v290_v20  ;;  %v270_v32 = vmax.f32 %v268_v27, 0.0  ;;  %v271_v33 = vmax.f32 %v269_v28, 0.0 }
  0x4c   : > { %344 = vmatpush.msra.mxu1 %v279_v22  ;;  %385 = vmatpush.msra.mxu2 %v358_v25 }
  0x4d   : > { %316 = vmatpush.msra.mxu0 %v289_v26  ;;  %539 = vmatpush.msra.mxu3 %v289_v26  ;;  %273 = vst.msk [vmem:[#allocation2 + $0x1] sm:$0xff] %vm272_vm1, %v270_v32 }
  0x4e   : > { %345 = vmatpush.msra.mxu1 %v278_v29  ;;  %386 = vmatpush.msra.mxu2 %v357_v30  ;;  %274 = vst.msk [vmem:[#allocation2 + $0x9] sm:$0xff] %vm272_vm1, %v271_v33 }
  0x4f   : > { %317 = vmatpush.msra.mxu0 %v288_v31  ;;  %540 = vmatpush.msra.mxu3 %v288_v31 }
  0x50   : > { %346 = vmatpush.msra.mxu1 %v277_v34 }
  0x54   : > { %v285_v35 = vld [vmem:[#allocation2 + $0x1] sm:$0xff] }
  0x55   : > { %v275_v36 = vld [vmem:[#allocation2] sm:$0xff]  ;;  %520 = vmatmul.msk.f32.vlgmr.msra.gmra.mxu0 %vm272_vm1, %v285_v35  ;;  %v286_v38 = vld [vmem:[#allocation2 + $0x9] sm:$0xff] }
  0x56   : > { %v354_v37 = vld [vmem:[#allocation2 + $0x2] sm:$0xff]  ;;  %522 = vmatmul.msk.f32.vlgmr.msra.gmra.mxu1 %vm272_vm1, %v275_v36  ;;  %521 = vmatmul.msk.f32.vlgmr.msra.gmra.mxu3 %vm272_vm1, %v286_v38  ;;  %v355_v40 = vld [vmem:[#allocation2 + $0xa] sm:$0xff] }
  0x57   : > { %524 = vmatmul.msk.f32.vlgmr.msra.gmra.mxu2 %vm272_vm1, %v354_v37  ;;  %v276_v39 = vld [vmem:[#allocation2 + $0x8] sm:$0xff] }
  0x5e   : > { %523 = vmatmul.msk.f32.gmra.mxu1 %vm272_vm1, %v276_v39 }
  0x5f   : > { %525 = vmatmul.msk.f32.gmra.mxu2 %vm272_vm1, %v355_v40 }
  0xd2   : > { %v319_v42 = vpop.f32.mrf.mxu0 }
  0xd3   : > { %v348_v41 = vpop.f32.mrf.mxu1 }
  0xd4   : > { %v349_v43 = vadd.f32 %v348_v41, %v319_v42 }
  0xd9   : > { %v322_v46 = vpop.f32.mrf.mxu3 }
  0xda   : > { %v388_v44 = vpop.f32.mrf.mxu2 }
  0xdb   : > { %v394_v45 = vadd.f32 %v388_v44, %v349_v43  ;;  %v351_v47 = vpop.f32.mrf.mxu1 }
  0xdc   : > { %v352_v48 = vadd.f32 %v351_v47, %v322_v46 }
  0xdd   : > { %396 = vst [vmem:[%s924_s1] sm:$0xff] %v394_v45 }
  0xe2   : > { %v391_v49 = vpop.f32.mrf.mxu2 }
  0xe3   : > { %v395_v50 = vadd.f32 %v391_v49, %v352_v48 }
  0xe5   : > { %397 = vst [vmem:[%s924_s1 + $0x8] sm:$0xff] %v395_v50 }
  0xe6   : > { %732 = shalt.err (!%p729_p9)
}
  0xe7   : > { %s782_s20 = smov 128   ;;  %s783_s30 = smov 8  }
  0xe8   : > { %551 = dma.vmem_to_hbm [thread:$0]  (%p861_p11), %s412_s23, 256, %s414_s6, %s399_s25, %s782_s20, %s782_s20, %s783_s30  }
  0xe9 PF: > { %s428_s9 = sand.u32 1, %s763_s15   ;;  %p994_p10 = scmp.ge.s32.totalorder %s775_s18, 2 }
  0xea   : > { %s429_s10 = scalar_lea.sflag [#allocation5], %s428_s9 }
  0xeb   : > { %p565_p0 = pnand %p994_p10, %p865_p12 }
  0xed   : > { %p566_p3 = pneg %p565_p0 }
  0xef   : > { %758 = dma.done.wait (%p566_p3), %s429_s10, 256  }
  0xf0   : > { %760 = vsyncadd (%p566_p3), %s429_s10, 4294967040  ;;  %s995_s1 = sld [smem:[#allocation13_spill]]  ;;  %p18_p7 = scmp.ge.s32.totalorder %s834_s21, 4  }
  0xf1   : > { %s996_s15 = smov %s767_s16  ;;  %s997_s16 = smov %s771_s17 }
  0xf2   : > { %s999_s18 = smov %s834_s21  ;;  %20 = sbr.rel (!%p18_p7) target bundleno = 9 (0x9), region = 95 }
  0xf6   : > { %s998_s17 = smov %s995_s1 }
  0xf7   :  { %435 = vsyncpa [#allocation4], 1 }
  0xf8   :  { %437 = vsyncpa [#allocation4 + $0x1], 1 }
  0xf9   :  { %438 = vsyncpa [#allocation7], 1 }
  0xfa   :  { %439 = vsyncpa [#allocation5], 1 }
  0xfb   :  { %441 = vsyncpa [#allocation5 + $0x1], 1 }

</bundles_post_ra>
